<compile_context>
chip_gen: v6e
topology: v6e:2x2x1
jax: 0.10.0
libtpu: 0.0.40
codegen_flags: <defaults>
</compile_context>

<pallas_src>
import functools

import jax
import jax.numpy as jnp
from jax import lax
from jax.experimental import pallas as pl
from jax.experimental.pallas import tpu as pltpu

EPS = 1e-5      # PyTorch LayerNorm default eps
LANE = 128
SUBLANE = 8


def _round_up(n, m):
    return ((n + m - 1) // m) * m


# ---------------- in-kernel helpers ----------------


def _masked_layernorm(x, gamma, beta, mask, nreal):
    """LayerNorm over the `nreal` real lanes of a lane-padded feature axis.

    `mask` is 1.0 on real lanes, 0.0 on pad lanes (real lanes may be scattered, e.g. the
    fwd/bwd GRU halves live at [0:H] and [Hp:Hp+H]). Pad lanes of the output are 0.
    """
    inv_n = 1.0 / float(nreal)
    mu = jnp.sum(x * mask, axis=-1, keepdims=True) * inv_n
    d = (x - mu) * mask
    var = jnp.sum(d * d, axis=-1, keepdims=True) * inv_n   # biased var, like PyTorch
    return d * lax.rsqrt(var + EPS) * gamma + beta


# ---------------- Pallas kernels ----------------


def masked_ln_kernel(x_ref, g_ref, b_ref, m_ref, o_ref, *, nreal):
    # x_ref: (rows_tile, F)   g/b/m: (1, F)
    o_ref[...] = _masked_layernorm(x_ref[...], g_ref[...], b_ref[...], m_ref[...], nreal)


def classifier_kernel(x_ref, g_ref, b_ref, m_ref, w_ref, bias_ref, o_ref, *, nreal):
    # Fused LayerNorm(2H) + Linear(2H -> C); output last dim is lane-dense (Cp = 128k).
    # TODO(synk): classifier Dropout omitted (inference mode == identity).
    h = _masked_layernorm(x_ref[...], g_ref[...], b_ref[...], m_ref[...], nreal)
    o_ref[...] = (jnp.dot(h, w_ref[...], preferred_element_type=jnp.float32)
                  + bias_ref[...])


def bigru_kernel(x_ref, wih_ref, bih_ref, whh_f_ref, whh_b_ref, bhh_f_ref, bhh_b_ref,
                 o_ref, gi_f_ref, gi_b_ref, *, hidden_p, seq_len):
    # x_ref:   (T, Bt, Din_p)           time-major input block (one batch tile)
    # wih_ref: (Din_p, 6*Hp)            [fwd r,z,n | bwd r,z,n], zero-padded rows/lanes
    # bih_ref: (1, 6*Hp)
    # whh_*:   (Hp, 3*Hp)    bhh_*: (1, 3*Hp)
    # o_ref:   (T, Bt, 2*Hp)            [:, :, :Hp] = forward, [:, :, Hp:] = backward
    # gi_*_ref scratch: (T*Bt, 3*Hp)    hoisted input-projection gates per direction
    T = seq_len
    Hp = hidden_p
    Bt = x_ref.shape[1]
    Dp = x_ref.shape[2]

    # Hoisted input projection for BOTH directions: one big MXU matmul over all timesteps.
    x_all = x_ref[...].reshape(T * Bt, Dp)
    gi_all = (jnp.dot(x_all, wih_ref[...], preferred_element_type=jnp.float32)
              + bih_ref[...])                                   # (T*Bt, 6*Hp)
    gi_f_ref[...] = gi_all[:, : 3 * Hp]
    gi_b_ref[...] = gi_all[:, 3 * Hp:]

    whh_f = whh_f_ref[...]
    whh_b = whh_b_ref[...]
    bhh_f = bhh_f_ref[...]
    bhh_b = bhh_b_ref[...]

    def gru_gates(gi, gh, h):
        # PyTorch GRU gate order r, z, n; bhh_n stays inside the r * (.) term via gh.
        r = jax.nn.sigmoid(gi[:, :Hp] + gh[:, :Hp])
        z = jax.nn.sigmoid(gi[:, Hp:2 * Hp] + gh[:, Hp:2 * Hp])
        n = jnp.tanh(gi[:, 2 * Hp:] + r * gh[:, 2 * Hp:])
        return (1.0 - z) * n + z * h

    def step(i, carry):
        h_f, h_b = carry
        tb = T - 1 - i
        row_f = pl.multiple_of(i * Bt, SUBLANE)
        row_b = pl.multiple_of(tb * Bt, SUBLANE)
        gi_f = gi_f_ref[pl.ds(row_f, Bt), :]
        gi_b = gi_b_ref[pl.ds(row_b, Bt), :]
        # Only the recurrent matmuls remain on the serial critical path.
        gh_f = jnp.dot(h_f, whh_f, preferred_element_type=jnp.float32) + bhh_f
        gh_b = jnp.dot(h_b, whh_b, preferred_element_type=jnp.float32) + bhh_b
        h_f = gru_gates(gi_f, gh_f, h_f)
        h_b = gru_gates(gi_b, gh_b, h_b)
        o_ref[i, :, 0:Hp] = h_f
        o_ref[tb, :, Hp:2 * Hp] = h_b
        return (h_f, h_b)

    h0 = jnp.zeros((Bt, Hp), jnp.float32)
    lax.fori_loop(0, T, step, (h0, h0), unroll=2)


# ---------------- pallas_call wrappers ----------------


def run_masked_ln(x2d, gamma, beta, mask, nreal):
    rows, F = x2d.shape
    rt = min(rows, 256)                      # rows is always a multiple of 8
    rows_p = _round_up(rows, rt)
    if rows_p != rows:
        x2d = jnp.pad(x2d, ((0, rows_p - rows), (0, 0)))
    kern = functools.partial(masked_ln_kernel, nreal=nreal)
    out = pl.pallas_call(
        kern,
        out_shape=jax.ShapeDtypeStruct((rows_p, F), jnp.float32),
        grid_spec=pltpu.PrefetchScalarGridSpec(
            num_scalar_prefetch=0,
            grid=(rows_p // rt,),
            in_specs=[
                pl.BlockSpec((rt, F), lambda i: (i, 0)),
                pl.BlockSpec((1, F), lambda i: (0, 0)),
                pl.BlockSpec((1, F), lambda i: (0, 0)),
                pl.BlockSpec((1, F), lambda i: (0, 0)),
            ],
            out_specs=pl.BlockSpec((rt, F), lambda i: (i, 0)),
        ),
        compiler_params=pltpu.CompilerParams(dimension_semantics=("parallel",)),
    )(x2d, gamma, beta, mask)
    return out[:rows]


def run_classifier(x2d, gamma, beta, mask, w, bias, nreal):
    rows, F = x2d.shape
    Cp = w.shape[1]
    rt = min(rows, 256)
    rows_p = _round_up(rows, rt)
    if rows_p != rows:
        x2d = jnp.pad(x2d, ((0, rows_p - rows), (0, 0)))
    kern = functools.partial(classifier_kernel, nreal=nreal)
    out = pl.pallas_call(
        kern,
        out_shape=jax.ShapeDtypeStruct((rows_p, Cp), jnp.float32),
        grid_spec=pltpu.PrefetchScalarGridSpec(
            num_scalar_prefetch=0,
            grid=(rows_p // rt,),
            in_specs=[
                pl.BlockSpec((rt, F), lambda i: (i, 0)),
                pl.BlockSpec((1, F), lambda i: (0, 0)),
                pl.BlockSpec((1, F), lambda i: (0, 0)),
                pl.BlockSpec((1, F), lambda i: (0, 0)),
                pl.BlockSpec((F, Cp), lambda i: (0, 0)),
                pl.BlockSpec((1, Cp), lambda i: (0, 0)),
            ],
            out_specs=pl.BlockSpec((rt, Cp), lambda i: (i, 0)),
        ),
        compiler_params=pltpu.CompilerParams(dimension_semantics=("parallel",)),
    )(x2d, gamma, beta, mask, w, bias)
    return out[:rows]


def run_bigru_layer(x_tbd, wih, bih, whh_f, whh_b, bhh_f, bhh_b, hidden_p, bt=SUBLANE):
    T, Bp, Dp = x_tbd.shape
    Hp = hidden_p
    kern = functools.partial(bigru_kernel, hidden_p=Hp, seq_len=T)
    return pl.pallas_call(
        kern,
        out_shape=jax.ShapeDtypeStruct((T, Bp, 2 * Hp), jnp.float32),
        grid_spec=pltpu.PrefetchScalarGridSpec(
            num_scalar_prefetch=0,
            grid=(Bp // bt,),
            in_specs=[
                pl.BlockSpec((T, bt, Dp), lambda b: (0, b, 0)),
                pl.BlockSpec((Dp, 6 * Hp), lambda b: (0, 0)),
                pl.BlockSpec((1, 6 * Hp), lambda b: (0, 0)),
                pl.BlockSpec((Hp, 3 * Hp), lambda b: (0, 0)),
                pl.BlockSpec((Hp, 3 * Hp), lambda b: (0, 0)),
                pl.BlockSpec((1, 3 * Hp), lambda b: (0, 0)),
                pl.BlockSpec((1, 3 * Hp), lambda b: (0, 0)),
            ],
            out_specs=pl.BlockSpec((T, bt, 2 * Hp), lambda b: (0, b, 0)),
            scratch_shapes=[pltpu.VMEM((T * bt, 3 * Hp), jnp.float32),
                            pltpu.VMEM((T * bt, 3 * Hp), jnp.float32)],
        ),
        compiler_params=pltpu.CompilerParams(dimension_semantics=("parallel",)),
    )(x_tbd, wih, bih, whh_f, whh_b, bhh_f, bhh_b)


# ---------------- forward pass ----------------


def seq_tagger_forward(params, tokens):
    E, Ep = params["embed_dim"], params["embed_dim_p"]
    H, Hp = params["hidden_size"], params["hidden_size_p"]
    C, Cp = params["num_class"], params["num_class_p"]
    B, T = tokens.shape
    Bp = _round_up(B, SUBLANE)

    # Embedding lookup (XLA gather), time-major; padded batch rows are sliced out at the end.
    # TODO(synk): the gather could be fused into the LN kernel via PrefetchScalarGridSpec
    #             row gather; kept as jnp.take for simplicity.
    tok = jnp.pad(tokens, ((0, Bp - B), (0, 0)))
    emb = jnp.take(params["embedding_p"], tok.T, axis=0)          # (T, Bp, Ep), pad lanes = 0

    # Embedding LayerNorm (Pallas, row-tiled grid).
    x = run_masked_ln(emb.reshape(T * Bp, Ep),
                      params["embed_ln_g_p"], params["embed_ln_b_p"],
                      params["embed_mask"], nreal=E).reshape(T, Bp, Ep)

    # Fused bidirectional multi-layer GRU (Pallas), time-major, both directions per kernel.
    for layer in params["gru_layers"]:
        x = run_bigru_layer(x, layer["wih_p"], layer["bih_p"],
                            layer["whh_f_p"], layer["whh_b_p"],
                            layer["bhh_f_p"], layer["bhh_b_p"],
                            hidden_p=Hp)                          # (T, Bp, 2*Hp)
        # TODO(synk): inter-layer RNN dropout omitted (inference mode == identity).

    # Classifier: LayerNorm(2H) + Linear(2H -> C) with lane-dense padded output.
    logits_p = run_classifier(x.reshape(T * Bp, 2 * Hp),
                              params["cls_ln_g_p"], params["cls_ln_b_p"],
                              params["cls_mask"], params["cls_w_p"], params["cls_b_p"],
                              nreal=2 * H)                        # (T*Bp, Cp)
    logits = logits_p.reshape(T, Bp, Cp)[:, :B, :C]               # (T, B, C)
    # Match SeqTagger.forward: logits.transpose(1, 2) -> (B, num_class, T)
    return jnp.transpose(logits, (1, 2, 0))


# ---------------- deterministic parameter init (padded layout) ----------------


def _pad_gate_cols(w, H, Hp):
    # (..., 3H) -> (..., 3Hp): zero-pad each r|z|n gate block to Hp lanes.
    if Hp == H:
        return w
    blocks = [jnp.pad(w[..., g * H:(g + 1) * H],
                      [(0, 0)] * (w.ndim - 1) + [(0, Hp - H)]) for g in range(3)]
    return jnp.concatenate(blocks, axis=-1)


def _scatter_rows(w, row_blocks, rows_p):
    # Place real input rows of `w` into a zero (rows_p, cols) matrix at padded row offsets.
    out = jnp.zeros((rows_p, w.shape[1]), w.dtype)
    for rs, ln, ps in row_blocks:
        out = out.at[ps:ps + ln, :].set(w[rs:rs + ln, :])
    return out


def init_params(key, vocab_size, embed_dim, hidden_size, num_layers, num_class):
    E, H, C = embed_dim, hidden_size, num_class
    Ep = _round_up(E, LANE)
    Hp = _round_up(H, LANE)
    Cp = _round_up(C, LANE)

    keys = jax.random.split(key, 2 + num_layers)
    scale = 1.0 / float(H) ** 0.5                 # PyTorch GRU default init range

    # Pretrained-style embedding table, zero-padded lanes so padded features stay 0.
    emb = jax.random.normal(keys[0], (vocab_size, E), jnp.float32)
    embedding_p = jnp.pad(emb, ((0, 0), (0, Ep - E)))

    embed_mask = jnp.zeros((1, Ep), jnp.float32).at[0, :E].set(1.0)
    cls_mask = (jnp.zeros((1, 2 * Hp), jnp.float32)
                .at[0, :H].set(1.0).at[0, Hp:Hp + H].set(1.0))

    # Classifier Linear: init_method='normal' -> std 0.02, zero bias; padded lane-dense.
    w_real = 0.02 * jax.random.normal(keys[1], (2 * H, C), jnp.float32)
    w_cols = jnp.pad(w_real, ((0, 0), (0, Cp - C)))
    cls_w_p = _scatter_rows(w_cols, [(0, H, 0), (H, H, Hp)], 2 * Hp)

    params = dict(
        embed_dim=E, embed_dim_p=Ep,
        hidden_size=H, hidden_size_p=Hp,
        num_class=C, num_class_p=Cp,
        embedding_p=embedding_p,
        embed_mask=embed_mask,
        embed_ln_g_p=embed_mask * 1.0,            # LayerNorm weight=1 on real lanes
        embed_ln_b_p=jnp.zeros((1, Ep), jnp.float32),
        cls_mask=cls_mask,
        cls_ln_g_p=cls_mask * 1.0,
        cls_ln_b_p=jnp.zeros((1, 2 * Hp), jnp.float32),
        cls_w_p=cls_w_p,
        cls_b_p=jnp.zeros((1, Cp), jnp.float32),
        gru_layers=[],
    )

    for l in range(num_layers):
        if l == 0:
            din, din_p, row_blocks = E, Ep, [(0, E, 0)]
        else:
            din, din_p, row_blocks = 2 * H, 2 * Hp, [(0, H, 0), (H, H, Hp)]
        lk = jax.random.split(keys[2 + l], 8)

        def u(k, shape):
            return jax.random.uniform(k, shape, jnp.float32, -scale, scale)

        def pack_ih(w):     # (din, 3H) -> (din_p, 3Hp)
            return _scatter_rows(_pad_gate_cols(w, H, Hp), row_blocks, din_p)

        def pack_hh(w):     # (H, 3H) -> (Hp, 3Hp)
            return _scatter_rows(_pad_gate_cols(w, H, Hp), [(0, H, 0)], Hp)

        def pack_b(b):      # (3H,) -> (1, 3Hp)
            return _pad_gate_cols(b.reshape(1, 3 * H), H, Hp)

        wih_f = pack_ih(u(lk[0], (din, 3 * H)))
        whh_f = pack_hh(u(lk[1], (H, 3 * H)))
        bih_f = pack_b(u(lk[2], (3 * H,)))
        bhh_f = pack_b(u(lk[3], (3 * H,)))
        wih_b = pack_ih(u(lk[4], (din, 3 * H)))
        whh_b = pack_hh(u(lk[5], (H, 3 * H)))
        bih_b = pack_b(u(lk[6], (3 * H,)))
        bhh_b = pack_b(u(lk[7], (3 * H,)))

        params["gru_layers"].append(dict(
            wih_p=jnp.concatenate([wih_f, wih_b], axis=1),   # (din_p, 6Hp)
            bih_p=jnp.concatenate([bih_f, bih_b], axis=1),   # (1, 6Hp)
            whh_f_p=whh_f, whh_b_p=whh_b,
            bhh_f_p=bhh_f, bhh_b_p=bhh_b,
        ))
    return params


if __name__ == "__main__":
    # Small synthetic config consistent with the module:
    # vocab=64, embed/input_size=32, hidden=32, num_layers=2, bidirectional=True,
    # num_class=16, batch=2, seq_len=8, model_name='gru', eval mode.
    VOCAB, EMBED, HIDDEN, LAYERS, NCLASS = 64, 32, 32, 2, 16
    B, T = 2, 8

    key = jax.random.PRNGKey(0)
    pkey, tkey = jax.random.split(key)
    params = init_params(pkey, VOCAB, EMBED, HIDDEN, LAYERS, NCLASS)
    tokens = jax.random.randint(tkey, (B, T), 0, VOCAB, dtype=jnp.int32)

    logits = seq_tagger_forward(params, tokens)
    logits = jax.block_until_ready(logits)

    assert logits.shape == (B, NCLASS, T), logits.shape
    assert logits.dtype == jnp.float32
    assert bool(jnp.all(jnp.isfinite(logits)))
    print("KERNEL_OK")
</pallas_src>

<mosaic_0001>
module attributes {stable_mosaic.version = 11 : i64} {
  func.func @masked_ln_kernel(%arg0: i32, %arg1: memref<64x128xf32, #tpu.memory_space<vmem>>, %arg2: memref<1x128xf32, #tpu.memory_space<vmem>>, %arg3: memref<1x128xf32, #tpu.memory_space<vmem>>, %arg4: memref<1x128xf32, #tpu.memory_space<vmem>>, %arg5: memref<64x128xf32, #tpu.memory_space<vmem>>) attributes {dimension_semantics = [#tpu.dimension_semantics<parallel>], iteration_bounds = array<i64: 1>, scalar_prefetch = 0 : i64, scratch_operands = 0 : i64, tpu.core_type = #tpu.core_type<tc>, window_params = [{transform_indices = @transform_0, window_bounds = array<i64: 64, 128>}, {pipeline_mode = #tpu.pipeline_mode<synchronous>, transform_indices = @transform_1, window_bounds = array<i64: 1, 128>}, {pipeline_mode = #tpu.pipeline_mode<synchronous>, transform_indices = @transform_2, window_bounds = array<i64: 1, 128>}, {pipeline_mode = #tpu.pipeline_mode<synchronous>, transform_indices = @transform_3, window_bounds = array<i64: 1, 128>}, {transform_indices = @transform_4, window_bounds = array<i64: 64, 128>}]} {
    %c0 = arith.constant 0 : index
    %c0_0 = arith.constant 0 : index
    %0 = vector.load %arg1[%c0, %c0_0] : memref<64x128xf32, #tpu.memory_space<vmem>>, vector<64x128xf32>
    %c0_1 = arith.constant 0 : index
    %c0_2 = arith.constant 0 : index
    %1 = vector.load %arg2[%c0_1, %c0_2] : memref<1x128xf32, #tpu.memory_space<vmem>>, vector<1x128xf32>
    %c0_3 = arith.constant 0 : index
    %c0_4 = arith.constant 0 : index
    %2 = vector.load %arg3[%c0_3, %c0_4] : memref<1x128xf32, #tpu.memory_space<vmem>>, vector<1x128xf32>
    %c0_5 = arith.constant 0 : index
    %c0_6 = arith.constant 0 : index
    %3 = vector.load %arg4[%c0_5, %c0_6] : memref<1x128xf32, #tpu.memory_space<vmem>>, vector<1x128xf32>
    %4 = vector.broadcast %3 : vector<1x128xf32> to vector<64x128xf32>
    %5 = arith.mulf %0, %4 : vector<64x128xf32>
    %cst = arith.constant dense<0.000000e+00> : vector<64xf32>
    %6 = vector.multi_reduction <add>, %5, %cst [1] : vector<64x128xf32> to vector<64xf32>
    %7 = vector.shape_cast %6 : vector<64xf32> to vector<64x1xf32>
    %cst_7 = arith.constant 3.125000e-02 : f32
    %8 = vector.broadcast %cst_7 : f32 to vector<64x1xf32>
    %9 = arith.mulf %7, %8 : vector<64x1xf32>
    %10 = vector.broadcast %9 : vector<64x1xf32> to vector<64x128xf32>
    %11 = arith.subf %0, %10 : vector<64x128xf32>
    %12 = vector.broadcast %3 : vector<1x128xf32> to vector<64x128xf32>
    %13 = arith.mulf %11, %12 : vector<64x128xf32>
    %14 = arith.mulf %13, %13 : vector<64x128xf32>
    %cst_8 = arith.constant dense<0.000000e+00> : vector<64xf32>
    %15 = vector.multi_reduction <add>, %14, %cst_8 [1] : vector<64x128xf32> to vector<64xf32>
    %16 = vector.shape_cast %15 : vector<64xf32> to vector<64x1xf32>
    %cst_9 = arith.constant 3.125000e-02 : f32
    %17 = vector.broadcast %cst_9 : f32 to vector<64x1xf32>
    %18 = arith.mulf %16, %17 : vector<64x1xf32>
    %cst_10 = arith.constant 9.99999974E-6 : f32
    %19 = vector.broadcast %cst_10 : f32 to vector<64x1xf32>
    %20 = arith.addf %18, %19 : vector<64x1xf32>
    %21 = math.rsqrt %20 : vector<64x1xf32>
    %22 = vector.broadcast %21 : vector<64x1xf32> to vector<64x128xf32>
    %23 = arith.mulf %13, %22 : vector<64x128xf32>
    %24 = vector.broadcast %1 : vector<1x128xf32> to vector<64x128xf32>
    %25 = arith.mulf %23, %24 : vector<64x128xf32>
    %26 = vector.broadcast %2 : vector<1x128xf32> to vector<64x128xf32>
    %27 = arith.addf %25, %26 : vector<64x128xf32>
    %c0_11 = arith.constant 0 : index
    %c0_12 = arith.constant 0 : index
    %28 = vector.load %arg5[%c0_11, %c0_12] : memref<64x128xf32, #tpu.memory_space<vmem>>, vector<64x128xf32>
    tpu.vector_store %arg5[%c0_11, %c0_12], %27 {strides = array<i32>} : memref<64x128xf32, #tpu.memory_space<vmem>>, vector<64x128xf32>,
    return
  }
  func.func @transform_0(%arg0: i32) -> (i32, i32) {
    %c0_i32 = arith.constant 0 : i32
    %c0_i32_0 = arith.constant 0 : i32
    return %arg0, %c0_i32 : i32, i32
  }
  func.func @transform_1(%arg0: i32) -> (i32, i32) {
    %c0_i32 = arith.constant 0 : i32
    %c0_i32_0 = arith.constant 0 : i32
    %c0_i32_1 = arith.constant 0 : i32
    return %c0_i32, %c0_i32_0 : i32, i32
  }
  func.func @transform_2(%arg0: i32) -> (i32, i32) {
    %c0_i32 = arith.constant 0 : i32
    %c0_i32_0 = arith.constant 0 : i32
    %c0_i32_1 = arith.constant 0 : i32
    return %c0_i32, %c0_i32_0 : i32, i32
  }
  func.func @transform_3(%arg0: i32) -> (i32, i32) {
    %c0_i32 = arith.constant 0 : i32
    %c0_i32_0 = arith.constant 0 : i32
    %c0_i32_1 = arith.constant 0 : i32
    return %c0_i32, %c0_i32_0 : i32, i32
  }
  func.func @transform_4(%arg0: i32) -> (i32, i32) {
    %c0_i32 = arith.constant 0 : i32
    %c0_i32_0 = arith.constant 0 : i32
    return %arg0, %c0_i32 : i32, i32
  }
}

</mosaic_0001>

<bundles_post_ra>
// kernel: tpu_custom_call.1
= control target key start
LH: loop header
LB: loop body
LE: loop exit
PB: predicated region body
PF: predicated region fallthrough
CT: control target
= control target key end

     0   :  { %9 = vsyncpa [#allocation3], 0  ;;  %s381_s0 = inlined_call_operand.hbm [shape: f32[64,128], index: 0, kind: input, shape index: {}]   ;;  %s382_s1 = inlined_call_operand.vmem [shape: f32[1,128], index: 1, kind: input, shape index: {}]   ;;  %s383_s2 = inlined_call_operand.vmem [shape: f32[1,128], index: 2, kind: input, shape index: {}]   ;;  %s384_s3 = inlined_call_operand.vmem [shape: f32[1,128], index: 3, kind: input, shape index: {}]   ;;  %s385_s4 = inlined_call_operand.hbm [shape: f32[64,128], index: 4, kind: output, shape index: {}]  }
   0x1   :  { %10 = vsyncpa [#allocation4], 0  ;;  %s273_s15 = smov [#allocation2]  }
   0x2   :  { %s16_s16 = sshll.u32 %s273_s15, 4  ;;  %s17_s16 = int_to_ptr.vmem [resolvable:$true] %s16_s16 }
   0x3   :  { %s237_s17 = scalar_lea.vmem %s17_s16, 1024  ;;  %p242_p1 = scmp.lt.s32.totalorder %s17_s16, %s17_s16 }
   0x4   :  { %p238_p0 = scmp.ne.s32.totalorder %s17_s16, %s237_s17  ;;  %p243_p2 = scmp.lt.s32.totalorder %s237_s17, %s237_s17 }
   0x6   :  { %p244_p3 = por %p243_p2, %p242_p1 }
   0x8   :  { %p245_p4 = pnand %p244_p3, %p238_p0 }
   0xa   :  { %248 = shalt.err (!%p245_p4)
}
   0xb   :  { %s274_s18 = smov 128   ;;  %s275_s19 = smov 8  }
   0xc   :  { %22 = dma.hbm_to_vmem [thread:$0]  %s381_s0, 1024, %s17_s16, [#allocation3], %s274_s18, %s274_s18, %s275_s19  }
   0xd   :  { %269 = dma.done.wait [#allocation3], 1024  }
   0xe   :  { %270 = vsyncadd [#allocation3], 4294966272  ;;  %v32_v0 = vld [vmem:[#allocation2] sm:$0xff]  ;;  %v34_v2 = vld [vmem:[#allocation2 + $0x10] sm:$0xff] }
   0xf   :  { %v311_v1 = vld [vmem:[%s384_s3] ss:$0 sm:$0xff]  ;;  %v33_v5 = vld [vmem:[#allocation2 + $0x8] sm:$0xff]  ;;  %v35_v6 = vld [vmem:[#allocation2 + $0x18] sm:$0xff] }
  0x10   :  { %v49_v3 = vmul.f32 %v311_v1, %v32_v0  ;;  %v51_v4 = vmul.f32 %v311_v1, %v34_v2  ;;  %v50_v7 = vmul.f32 %v311_v1, %v33_v5  ;;  %v52_v8 = vmul.f32 %v311_v1, %v35_v6  ;;  %v36_v9 = vld [vmem:[#allocation2 + $0x20] sm:$0xff]  ;;  %v37_v10 = vld [vmem:[#allocation2 + $0x28] sm:$0xff]  ;;  %v38_v13 = vld [vmem:[#allocation2 + $0x30] sm:$0xff] }
  0x11   :  { %v53_v11 = vmul.f32 %v311_v1, %v36_v9  ;;  %v54_v12 = vmul.f32 %v311_v1, %v37_v10  ;;  %v39_v14 = vld [vmem:[#allocation2 + $0x38] sm:$0xff]  ;;  %v55_v15 = vmul.f32 %v311_v1, %v38_v13 }
  0x12   :  { %57 = vadd.xlane.f32.xlu0 %v49_v3  ;;  %61 = vadd.xlane.f32.xlu1 %v51_v4  ;;  %v56_v16 = vmul.f32 %v311_v1, %v39_v14 }
  0x16   :  { %59 = vadd.xlane.f32.xlu0 %v50_v7  ;;  %63 = vadd.xlane.f32.xlu1 %v52_v8 }
  0x1a   :  { %65 = vadd.xlane.f32.xlu0 %v53_v11  ;;  %67 = vadd.xlane.f32.xlu1 %v54_v12 }
  0x1e   :  { %69 = vadd.xlane.f32.xlu0 %v55_v15  ;;  %71 = vadd.xlane.f32.xlu1 %v56_v16 }
  0x9b   :  { %v58_v17 = vpop.xlane.xlu0 %57  ;;  %v62_v18 = vpop.xlane.xlu1 %61 }
  0x9c   :  { %v73_v19 = vmul.f32 0.03125, %v58_v17  ;;  %v75_v20 = vmul.f32 0.03125, %v62_v18  ;;  %v207_v17 = vld [vmem:[%s382_s1] ss:$0 sm:$0xff]  ;;  %s276_s1 = smov [#allocation5]  }
  0x9e   :  { %v81_v21 = vsub.f32 %v32_v0, %v73_v19  ;;  %v83_v22 = vsub.f32 %v34_v2, %v75_v20  ;;  %v208_v20 = vld [vmem:[%s383_s2] ss:$0 sm:$0xff]  ;;  %s194_s2 = sshll.u32 %s276_s1, 4  ;;  %s195_s2 = int_to_ptr.vmem [resolvable:$true] %s194_s2 }
  0x9f   :  { %v60_v23 = vpop.xlane.xlu0 %59  ;;  %v64_v24 = vpop.xlane.xlu1 %63  ;;  %s249_s26 = scalar_lea.vmem %s195_s2, 1024  ;;  %p254_p6 = scmp.lt.s32.totalorder %s195_s2, %s195_s2 }
  0xa0   :  { %v74_v25 = vmul.f32 0.03125, %v60_v23  ;;  %v76_v26 = vmul.f32 0.03125, %v64_v24  ;;  %v322_v27 = vmul.f32 %v311_v1, %v81_v21  ;;  %v325_v28 = vmul.f32 %v311_v1, %v83_v22  ;;  %p250_p5 = scmp.ne.s32.totalorder %s195_s2, %s249_s26  ;;  %p255_p7 = scmp.lt.s32.totalorder %s249_s26, %s249_s26 }
  0xa2   :  { %v82_v29 = vsub.f32 %v33_v5, %v74_v25  ;;  %v84_v30 = vsub.f32 %v35_v6, %v76_v26  ;;  %v97_v31 = vmul.f32 %v322_v27, %v322_v27  ;;  %v99_v34 = vmul.f32 %v325_v28, %v325_v28  ;;  %p256_p8 = por %p255_p7, %p254_p6 }
  0xa3   :  { %v66_v32 = vpop.xlane.xlu0 %65  ;;  %v68_v33 = vpop.xlane.xlu1 %67 }
  0xa4   :  { %v77_v35 = vmul.f32 0.03125, %v66_v32  ;;  %105 = vadd.xlane.f32.xlu0 %v97_v31  ;;  %v78_v36 = vmul.f32 0.03125, %v68_v33  ;;  %v332_v37 = vmul.f32 %v311_v1, %v82_v29  ;;  %v335_v38 = vmul.f32 %v311_v1, %v84_v30  ;;  %p257_p9 = pnand %p256_p8, %p250_p5 }
  0xa6   :  { %v85_v39 = vsub.f32 %v36_v9, %v77_v35  ;;  %v86_v40 = vsub.f32 %v37_v10, %v78_v36  ;;  %v98_v41 = vmul.f32 %v332_v37, %v332_v37  ;;  %v100_v44 = vmul.f32 %v335_v38, %v335_v38 }
  0xa7   :  { %v70_v42 = vpop.xlane.xlu0 %69  ;;  %v72_v43 = vpop.xlane.xlu1 %71 }
  0xa8   :  { %v79_v45 = vmul.f32 0.03125, %v70_v42  ;;  %109 = vadd.xlane.f32.xlu0 %v99_v34  ;;  %107 = vadd.xlane.f32.xlu1 %v98_v41  ;;  %v80_v46 = vmul.f32 0.03125, %v72_v43  ;;  %v342_v47 = vmul.f32 %v311_v1, %v85_v39  ;;  %v345_v48 = vmul.f32 %v311_v1, %v86_v40 }
  0xaa   :  { %v87_v49 = vsub.f32 %v38_v13, %v79_v45  ;;  %v88_v50 = vsub.f32 %v39_v14, %v80_v46  ;;  %v101_v51 = vmul.f32 %v342_v47, %v342_v47  ;;  %v102_v52 = vmul.f32 %v345_v48, %v345_v48 }
  0xac   :  { %111 = vadd.xlane.f32.xlu1 %v100_v44  ;;  %113 = vadd.xlane.f32.xlu0 %v101_v51  ;;  %v352_v53 = vmul.f32 %v311_v1, %v87_v49  ;;  %v355_v54 = vmul.f32 %v311_v1, %v88_v50 }
  0xae   :  { %v103_v55 = vmul.f32 %v352_v53, %v352_v53  ;;  %v104_v56 = vmul.f32 %v355_v54, %v355_v54 }
  0xb0   :  { %115 = vadd.xlane.f32.xlu1 %v102_v52  ;;  %117 = vadd.xlane.f32.xlu0 %v103_v55 }
  0xb4   :  { %119 = vadd.xlane.f32.xlu1 %v104_v56 }
 0x12d   :  { %v106_v57 = vpop.xlane.xlu0 %105 }
 0x12e   :  { %v121_v58 = vmul.f32 0.03125, %v106_v57 }
 0x130   :  { %v129_v59 = vadd.f32 1e-05, %v121_v58 }
 0x131   :  { %v108_v60 = vpop.xlane.xlu1 %107  ;;  %v110_v61 = vpop.xlane.xlu0 %109 }
 0x132   :  { %213 = vrsqrt.f32 %v129_v59  ;;  %v122_v62 = vmul.f32 0.03125, %v108_v60  ;;  %v123_v63 = vmul.f32 0.03125, %v110_v61 }
 0x134   :  { %v130_v0 = vadd.f32 1e-05, %v122_v62  ;;  %v131_v1 = vadd.f32 1e-05, %v123_v63 }
 0x135   :  { %v112_v2 = vpop.xlane.xlu1 %111  ;;  %v114_v3 = vpop.xlane.xlu0 %113 }
 0x136   :  { %215 = vrsqrt.f32 %v130_v0  ;;  %v124_v4 = vmul.f32 0.03125, %v112_v2  ;;  %v125_v5 = vmul.f32 0.03125, %v114_v3 }
 0x137   :  { %217 = vrsqrt.f32 %v131_v1 }
 0x138   :  { %v132_v6 = vadd.f32 1e-05, %v124_v4  ;;  %v133_v7 = vadd.f32 1e-05, %v125_v5 }
 0x139   :  { %v116_v8 = vpop.xlane.xlu1 %115  ;;  %v118_v9 = vpop.xlane.xlu0 %117 }
 0x13a   :  { %219 = vrsqrt.f32 %v132_v6  ;;  %v126_v10 = vmul.f32 0.03125, %v116_v8  ;;  %v127_v11 = vmul.f32 0.03125, %v118_v9 }
 0x13b   :  { %221 = vrsqrt.f32 %v133_v7 }
 0x13c   :  { %v134_v12 = vadd.f32 1e-05, %v126_v10  ;;  %v135_v13 = vadd.f32 1e-05, %v127_v11 }
 0x13d   :  { %v120_v14 = vpop.xlane.xlu1 %119 }
 0x13e   :  { %223 = vrsqrt.f32 %v134_v12  ;;  %v128_v15 = vmul.f32 0.03125, %v120_v14 }
 0x13f   :  { %v214_v16 = vpop.eup %213  ;;  %225 = vrsqrt.f32 %v135_v13 }
 0x140   :  { %v145_v18 = vmul.f32 %v214_v16, %v322_v27  ;;  %v136_v19 = vadd.f32 1e-05, %v128_v15 }
 0x142   :  { %v159_v21 = vmul.f32 %v207_v17, %v145_v18  ;;  %227 = vrsqrt.f32 %v136_v19 }
 0x143   :  { %v216_v22 = vpop.eup %215 }
 0x144   :  { %v218_v23 = vpop.eup %217  ;;  %v173_v24 = vadd.f32 %v208_v20, %v159_v21  ;;  %v146_v25 = vmul.f32 %v216_v22, %v332_v37 }
 0x145   :  { %v147_v26 = vmul.f32 %v218_v23, %v325_v28 }
 0x146   :  { %181 = vst [vmem:[#allocation5] sm:$0xff] %v173_v24  ;;  %v160_v29 = vmul.f32 %v207_v17, %v146_v25 }
 0x147   :  { %v220_v30 = vpop.eup %219  ;;  %v161_v31 = vmul.f32 %v207_v17, %v147_v26 }
 0x148   :  { %v222_v32 = vpop.eup %221  ;;  %v174_v27 = vadd.f32 %v208_v20, %v160_v29  ;;  %v148_v33 = vmul.f32 %v220_v30, %v335_v38 }
 0x149   :  { %v175_v34 = vadd.f32 %v208_v20, %v161_v31  ;;  %v149_v35 = vmul.f32 %v222_v32, %v342_v47 }
 0x14a   :  { %182 = vst [vmem:[#allocation5 + $0x8] sm:$0xff] %v174_v27  ;;  %v162_v36 = vmul.f32 %v207_v17, %v148_v33 }
 0x14b   :  { %v224_v39 = vpop.eup %223  ;;  %183 = vst [vmem:[#allocation5 + $0x10] sm:$0xff] %v175_v34  ;;  %v163_v40 = vmul.f32 %v207_v17, %v149_v35 }
 0x14c   :  { %v226_v41 = vpop.eup %225  ;;  %v176_v37 = vadd.f32 %v208_v20, %v162_v36  ;;  %v150_v28 = vmul.f32 %v224_v39, %v345_v48 }
 0x14d   :  { %v177_v42 = vadd.f32 %v208_v20, %v163_v40  ;;  %v151_v43 = vmul.f32 %v226_v41, %v352_v53 }
 0x14e   :  { %184 = vst [vmem:[#allocation5 + $0x18] sm:$0xff] %v176_v37  ;;  %v164_v44 = vmul.f32 %v207_v17, %v150_v28 }
 0x14f   :  { %v228_v45 = vpop.eup %227  ;;  %185 = vst [vmem:[#allocation5 + $0x20] sm:$0xff] %v177_v42  ;;  %v165_v38 = vmul.f32 %v207_v17, %v151_v43 }
 0x150   :  { %v178_v46 = vadd.f32 %v208_v20, %v164_v44  ;;  %v152_v47 = vmul.f32 %v228_v45, %v355_v54 }
 0x151   :  { %v179_v49 = vadd.f32 %v208_v20, %v165_v38 }
 0x152   :  { %186 = vst [vmem:[#allocation5 + $0x28] sm:$0xff] %v178_v46  ;;  %v166_v50 = vmul.f32 %v207_v17, %v152_v47 }
 0x153   :  { %187 = vst [vmem:[#allocation5 + $0x30] sm:$0xff] %v179_v49 }
 0x154   :  { %v180_v51 = vadd.f32 %v208_v20, %v166_v50 }
 0x156   :  { %188 = vst [vmem:[#allocation5 + $0x38] sm:$0xff] %v180_v51 }
 0x157   :  { %260 = shalt.err (!%p257_p9)
}
 0x158   :  { %200 = dma.vmem_to_hbm [thread:$0]  %s195_s2, 1024, %s385_s4, [#allocation4], %s274_s18, %s274_s18, %s275_s19  }
 0x159   :  { %271 = dma.done.wait [#allocation4], 1024  }
 0x15a   :  { %272 = vsyncadd [#allocation4], 4294966272 }
 0x15b   :  { %204 = vsyncpa [#allocation3], 1 }
 0x15c   :  { %205 = vsyncpa [#allocation4], 1 }

</bundles_post_ra>
